<compile_context>
chip_gen: v6e
topology: v6e:2x2x1
jax: 0.10.0
libtpu: 0.0.40
codegen_flags: <defaults>
</compile_context>

<pallas_src>
import functools

import jax
import jax.numpy as jnp
from jax.experimental import pallas as pl
from jax.experimental.pallas import tpu as pltpu

_LANE = 128     # lane width (last dim)
_SUBLANE = 8    # f32 sublane width (second-to-last dim)


def _round_up(x, m):
    return (x + m - 1) // m * m


def _mlp_kernel(*refs, apply_relu):
    """refs = (x_ref, w0_ref, b0_ref, w1_ref, b1_ref, ..., o_ref).

    One batch tile per grid step; all layers chained inside the body so the
    intermediate activations never touch HBM.
    """
    x_ref = refs[0]
    o_ref = refs[-1]
    layer_refs = refs[1:-1]
    n_layers = len(apply_relu)

    # bf16 operands into the MXU, f32 accumulation.
    h = x_ref[...].astype(jnp.bfloat16)
    for li, relu in enumerate(apply_relu):
        w_ref = layer_refs[2 * li]        # (K, N) bf16, VMEM-resident
        b_ref = layer_refs[2 * li + 1]    # (1, N) f32
        acc = jnp.dot(h, w_ref[...], preferred_element_type=jnp.float32)
        acc = acc + b_ref[...]
        if relu:
            acc = jnp.maximum(acc, 0.0)
        # Dropout (eval mode) is identity -> nothing to do.
        if li == n_layers - 1:
            o_ref[...] = acc.astype(o_ref.dtype)
        else:
            # Keep the inter-layer activation bf16: halves its VMEM footprint
            # and feeds the next MXU pass natively (v6e/v7x bf16 VPU).
            h = acc.astype(jnp.bfloat16)


def mlp_forward_pallas(x, params, apply_relu, out_features, block_m=256):
    """Fused forward pass: x -> Linear(+ReLU) chain, single pallas_call.

    x:      (M, K0) float32
    params: list of (w_bf16 (K, N), b_f32 (1, N)); only the last layer's N is
            lane-padded to a multiple of 128.
    """
    M, K0 = x.shape
    assert params[0][0].shape[0] == K0
    N_last = params[-1][0].shape[1]           # multiple of 128 by construction

    # Batch tile: multiple of the sublane width, capped by the (rounded) batch.
    block_m = min(block_m, _round_up(M, _SUBLANE))
    M_pad = _round_up(M, block_m)
    # Pad rows only; feature dims are passed at full extent (no widened copy of
    # the activations materialized in HBM).
    x_in = x if M_pad == M else jnp.pad(x, ((0, M_pad - M), (0, 0)))

    widths = [K0] + [w.shape[1] for w, _ in params]
    w_bytes = sum(w.size * w.dtype.itemsize + b.size * b.dtype.itemsize
                  for w, b in params)

    def build(single_buffer_weights):
        in_specs = [pl.BlockSpec((block_m, K0), lambda i: (i, 0))]
        for w, b in params:
            k, n = w.shape
            if single_buffer_weights:
                # Constant index_map -> fetched once; no point double-buffering
                # a block that never changes (halves resident weight VMEM).
                w_spec = pl.BlockSpec((k, n), lambda i: (0, 0),
                                      pipeline_mode=pl.Buffered(1))
                b_spec = pl.BlockSpec((1, n), lambda i: (0, 0),
                                      pipeline_mode=pl.Buffered(1))
            else:
                w_spec = pl.BlockSpec((k, n), lambda i: (0, 0))
                b_spec = pl.BlockSpec((1, n), lambda i: (0, 0))
            in_specs.append(w_spec)
            in_specs.append(b_spec)

        # VMEM budget: double-buffered x/out blocks + resident params (x2 if
        # the single-buffer request is unavailable) + f32 intermediates.
        act_bytes = 2 * block_m * (K0 + N_last) * 4
        inter_bytes = 2 * block_m * max(widths) * 4
        needed = act_bytes + inter_bytes + \
            (1 if single_buffer_weights else 2) * w_bytes
        vmem_limit = int(min(64 << 20, max(32 << 20, 2 * needed)))

        flops = 2 * M_pad * sum(w.shape[0] * w.shape[1] for w, _ in params)
        bytes_accessed = x_in.size * x_in.dtype.itemsize + w_bytes + \
            M_pad * N_last * 4

        return pl.pallas_call(
            functools.partial(_mlp_kernel, apply_relu=tuple(apply_relu)),
            out_shape=jax.ShapeDtypeStruct((M_pad, N_last), jnp.float32),
            grid=(M_pad // block_m,),
            in_specs=in_specs,
            out_specs=pl.BlockSpec((block_m, N_last), lambda i: (i, 0)),
            compiler_params=pltpu.CompilerParams(
                # Batch tiles are independent -> shard across TCs (megacore).
                dimension_semantics=("parallel",),
                vmem_limit_bytes=vmem_limit,
            ),
            cost_estimate=pl.CostEstimate(
                flops=flops, transcendentals=0, bytes_accessed=bytes_accessed),
        )

    args = [x_in]
    for w, b in params:
        args.append(w)
        args.append(b)

    try:
        out = build(single_buffer_weights=True)(*args)
    except Exception:
        # pipeline_mode=pl.Buffered on a pallas_call BlockSpec is not supported
        # by this jax build -> fall back to default (double) buffering.
        out = build(single_buffer_weights=False)(*args)
    return out[:M, :out_features]


class MLPPallas:
    """Mirror of the PyTorch MLP: Linear -> [Dropout] -> [ReLU] per entry."""

    def __init__(self, layers, dropout, activations, key):
        self.params = []       # kernel params: (w_bf16 (K, N), b_f32 (1, N))
        self.raw_params = []   # unpadded f32 (w_t (K, N), b (N,)) for reference
        self.apply_relu = []
        self.out_features = layers[-1][1]
        n_layers = len(layers)
        for idx, ((in_f, out_f), drop, relu) in enumerate(
                zip(layers, dropout, activations)):
            key, kw, kb = jax.random.split(key, 3)
            # Deterministic init (PyTorch-like uniform bound 1/sqrt(in_f)).
            bound = 1.0 / float(in_f) ** 0.5
            w = jax.random.uniform(kw, (out_f, in_f), jnp.float32, -bound, bound)
            b = jax.random.uniform(kb, (out_f,), jnp.float32, -bound, bound)
            w_t = jnp.asarray(w.T)                    # (K, N) row-major matmul
            self.raw_params.append((w_t, b))

            # Only the FINAL layer's N is lane-padded to 128 (unmasked vst on
            # the output store). K and hidden Ns keep their true extent: a
            # block equal to the full array dim satisfies the (8,128) rule, and
            # padding small K to 128 would just multiply MXU work and bytes.
            n_kernel = _round_up(out_f, _LANE) if idx == n_layers - 1 else out_f
            w_pad = jnp.zeros((in_f, n_kernel), jnp.float32).at[:, :out_f].set(w_t)
            b_pad = jnp.zeros((1, n_kernel), jnp.float32).at[0, :out_f].set(b)
            # Zero padding stays exact under the bf16 cast.
            self.params.append((w_pad.astype(jnp.bfloat16), b_pad))
            self.apply_relu.append(relu is not None)

    def __call__(self, x, block_m=256):
        return mlp_forward_pallas(x, self.params, self.apply_relu,
                                  self.out_features, block_m=block_m)


if __name__ == "__main__":
    key = jax.random.PRNGKey(0)
    key, kx, kp = jax.random.split(key, 3)

    # Small MLP consistent with the module's constructor signature.
    layers = [(32, 64), (64, 32), (32, 16)]
    dropout = [0.5, None, None]          # identity in eval mode
    activations = [True, True, None]     # ReLU after first two layers

    batch = 8
    x = jax.random.normal(kx, (batch, layers[0][0]), jnp.float32)

    mlp = MLPPallas(layers, dropout, activations, kp)
    y = jax.block_until_ready(mlp(x))
    assert y.shape == (batch, layers[-1][1])

    # Reference 1: mirrors the kernel numerics (bf16 operands, f32 accumulate).
    ref = x.astype(jnp.bfloat16)
    n_layers = len(mlp.params)
    for li, ((w_bf, b_f), relu) in enumerate(zip(mlp.params, mlp.apply_relu)):
        ref = jnp.dot(ref, w_bf, preferred_element_type=jnp.float32) + b_f
        if relu:
            ref = jnp.maximum(ref, 0.0)
        if li != n_layers - 1:
            ref = ref.astype(jnp.bfloat16)
    ref = ref[:, :mlp.out_features]
    assert jnp.allclose(y, ref, atol=2e-3, rtol=2e-3), \
        float(jnp.max(jnp.abs(y - ref)))

    # Reference 2: pure f32 chain, bf16-appropriate tolerance.
    ref32 = x
    for (w_t, b), relu in zip(mlp.raw_params, mlp.apply_relu):
        ref32 = ref32 @ w_t + b
        if relu:
            ref32 = jnp.maximum(ref32, 0.0)
    assert jnp.allclose(y, ref32, atol=5e-2, rtol=5e-2), \
        float(jnp.max(jnp.abs(y - ref32)))

    print("KERNEL_OK")
</pallas_src>

<mosaic_0001>
module attributes {stable_mosaic.version = 11 : i64} {
  func.func @_mlp_kernel(%arg0: i32, %arg1: memref<8x32xf32, #tpu.memory_space<vmem>>, %arg2: memref<32x64xbf16, #tpu.memory_space<vmem>>, %arg3: memref<1x64xf32, #tpu.memory_space<vmem>>, %arg4: memref<64x32xbf16, #tpu.memory_space<vmem>>, %arg5: memref<1x32xf32, #tpu.memory_space<vmem>>, %arg6: memref<32x128xbf16, #tpu.memory_space<vmem>>, %arg7: memref<1x128xf32, #tpu.memory_space<vmem>>, %arg8: memref<8x128xf32, #tpu.memory_space<vmem>>) attributes {dimension_semantics = [#tpu.dimension_semantics<parallel>], iteration_bounds = array<i64: 1>, scalar_prefetch = 0 : i64, scratch_operands = 0 : i64, tpu.core_type = #tpu.core_type<tc>, window_params = [{transform_indices = @transform_0, window_bounds = array<i64: 8, 32>}, {pipeline_mode = #tpu.pipeline_mode<synchronous>, transform_indices = @transform_1, window_bounds = array<i64: 32, 64>}, {pipeline_mode = #tpu.pipeline_mode<synchronous>, transform_indices = @transform_2, window_bounds = array<i64: 1, 64>}, {pipeline_mode = #tpu.pipeline_mode<synchronous>, transform_indices = @transform_3, window_bounds = array<i64: 64, 32>}, {pipeline_mode = #tpu.pipeline_mode<synchronous>, transform_indices = @transform_4, window_bounds = array<i64: 1, 32>}, {pipeline_mode = #tpu.pipeline_mode<synchronous>, transform_indices = @transform_5, window_bounds = array<i64: 32, 128>}, {pipeline_mode = #tpu.pipeline_mode<synchronous>, transform_indices = @transform_6, window_bounds = array<i64: 1, 128>}, {transform_indices = @transform_7, window_bounds = array<i64: 8, 128>}]} {
    %c0 = arith.constant 0 : index
    %c0_0 = arith.constant 0 : index
    %0 = vector.load %arg1[%c0, %c0_0] : memref<8x32xf32, #tpu.memory_space<vmem>>, vector<8x32xf32>
    %1 = arith.truncf %0 : vector<8x32xf32> to vector<8x32xbf16>
    %c0_1 = arith.constant 0 : index
    %c0_2 = arith.constant 0 : index
    %2 = vector.load %arg2[%c0_1, %c0_2] : memref<32x64xbf16, #tpu.memory_space<vmem>>, vector<32x64xbf16>
    %cst = arith.constant dense<0.000000e+00> : vector<8x64xf32>
    %3 = tpu.matmul %1, %2, %cst {dimension_numbers = #tpu.dot_dimension_numbers<[1], [0], [0], [1], [0, 0, 1, 1], [], []>} : vector<8x32xbf16>, vector<32x64xbf16>, vector<8x64xf32> -> vector<8x64xf32>
    %c0_3 = arith.constant 0 : index
    %c0_4 = arith.constant 0 : index
    %4 = vector.load %arg3[%c0_3, %c0_4] : memref<1x64xf32, #tpu.memory_space<vmem>>, vector<1x64xf32>
    %5 = vector.broadcast %4 : vector<1x64xf32> to vector<8x64xf32>
    %6 = arith.addf %3, %5 : vector<8x64xf32>
    %cst_5 = arith.constant 0.000000e+00 : f32
    %7 = vector.broadcast %cst_5 : f32 to vector<8x64xf32>
    %8 = arith.maximumf %6, %7 : vector<8x64xf32>
    %9 = arith.truncf %8 : vector<8x64xf32> to vector<8x64xbf16>
    %c0_6 = arith.constant 0 : index
    %c0_7 = arith.constant 0 : index
    %10 = vector.load %arg4[%c0_6, %c0_7] : memref<64x32xbf16, #tpu.memory_space<vmem>>, vector<64x32xbf16>
    %cst_8 = arith.constant dense<0.000000e+00> : vector<8x32xf32>
    %11 = tpu.matmul %9, %10, %cst_8 {dimension_numbers = #tpu.dot_dimension_numbers<[1], [0], [0], [1], [0, 0, 1, 1], [], []>} : vector<8x64xbf16>, vector<64x32xbf16>, vector<8x32xf32> -> vector<8x32xf32>
    %c0_9 = arith.constant 0 : index
    %c0_10 = arith.constant 0 : index
    %12 = vector.load %arg5[%c0_9, %c0_10] : memref<1x32xf32, #tpu.memory_space<vmem>>, vector<1x32xf32>
    %13 = vector.broadcast %12 : vector<1x32xf32> to vector<8x32xf32>
    %14 = arith.addf %11, %13 : vector<8x32xf32>
    %cst_11 = arith.constant 0.000000e+00 : f32
    %15 = vector.broadcast %cst_11 : f32 to vector<8x32xf32>
    %16 = arith.maximumf %14, %15 : vector<8x32xf32>
    %17 = arith.truncf %16 : vector<8x32xf32> to vector<8x32xbf16>
    %c0_12 = arith.constant 0 : index
    %c0_13 = arith.constant 0 : index
    %18 = vector.load %arg6[%c0_12, %c0_13] : memref<32x128xbf16, #tpu.memory_space<vmem>>, vector<32x128xbf16>
    %cst_14 = arith.constant dense<0.000000e+00> : vector<8x128xf32>
    %19 = tpu.matmul %17, %18, %cst_14 {dimension_numbers = #tpu.dot_dimension_numbers<[1], [0], [0], [1], [0, 0, 1, 1], [], []>} : vector<8x32xbf16>, vector<32x128xbf16>, vector<8x128xf32> -> vector<8x128xf32>
    %c0_15 = arith.constant 0 : index
    %c0_16 = arith.constant 0 : index
    %20 = vector.load %arg7[%c0_15, %c0_16] : memref<1x128xf32, #tpu.memory_space<vmem>>, vector<1x128xf32>
    %21 = vector.broadcast %20 : vector<1x128xf32> to vector<8x128xf32>
    %22 = arith.addf %19, %21 : vector<8x128xf32>
    %c0_17 = arith.constant 0 : index
    %c0_18 = arith.constant 0 : index
    %23 = vector.load %arg8[%c0_17, %c0_18] : memref<8x128xf32, #tpu.memory_space<vmem>>, vector<8x128xf32>
    tpu.vector_store %arg8[%c0_17, %c0_18], %22 {strides = array<i32>} : memref<8x128xf32, #tpu.memory_space<vmem>>, vector<8x128xf32>,
    return
  }
  func.func @transform_0(%arg0: i32) -> (i32, i32) {
    %c0_i32 = arith.constant 0 : i32
    %c0_i32_0 = arith.constant 0 : i32
    return %arg0, %c0_i32 : i32, i32
  }
  func.func @transform_1(%arg0: i32) -> (i32, i32) {
    %c0_i32 = arith.constant 0 : i32
    %c0_i32_0 = arith.constant 0 : i32
    %c0_i32_1 = arith.constant 0 : i32
    return %c0_i32, %c0_i32_0 : i32, i32
  }
  func.func @transform_2(%arg0: i32) -> (i32, i32) {
    %c0_i32 = arith.constant 0 : i32
    %c0_i32_0 = arith.constant 0 : i32
    %c0_i32_1 = arith.constant 0 : i32
    return %c0_i32, %c0_i32_0 : i32, i32
  }
  func.func @transform_3(%arg0: i32) -> (i32, i32) {
    %c0_i32 = arith.constant 0 : i32
    %c0_i32_0 = arith.constant 0 : i32
    %c0_i32_1 = arith.constant 0 : i32
    return %c0_i32, %c0_i32_0 : i32, i32
  }
  func.func @transform_4(%arg0: i32) -> (i32, i32) {
    %c0_i32 = arith.constant 0 : i32
    %c0_i32_0 = arith.constant 0 : i32
    %c0_i32_1 = arith.constant 0 : i32
    return %c0_i32, %c0_i32_0 : i32, i32
  }
  func.func @transform_5(%arg0: i32) -> (i32, i32) {
    %c0_i32 = arith.constant 0 : i32
    %c0_i32_0 = arith.constant 0 : i32
    %c0_i32_1 = arith.constant 0 : i32
    return %c0_i32, %c0_i32_0 : i32, i32
  }
  func.func @transform_6(%arg0: i32) -> (i32, i32) {
    %c0_i32 = arith.constant 0 : i32
    %c0_i32_0 = arith.constant 0 : i32
    %c0_i32_1 = arith.constant 0 : i32
    return %c0_i32, %c0_i32_0 : i32, i32
  }
  func.func @transform_7(%arg0: i32) -> (i32, i32) {
    %c0_i32 = arith.constant 0 : i32
    %c0_i32_0 = arith.constant 0 : i32
    return %arg0, %c0_i32 : i32, i32
  }
}

module attributes {stable_mosaic.version = 11 : i64} {
  func.func @_mlp_kernel(%arg0: i32, %arg1: memref<8x32xf32, #tpu.memory_space<vmem>>, %arg2: memref<32x64xbf16, #tpu.memory_space<vmem>>, %arg3: memref<1x64xf32, #tpu.memory_space<vmem>>, %arg4: memref<64x32xbf16, #tpu.memory_space<vmem>>, %arg5: memref<1x32xf32, #tpu.memory_space<vmem>>, %arg6: memref<32x128xbf16, #tpu.memory_space<vmem>>, %arg7: memref<1x128xf32, #tpu.memory_space<vmem>>, %arg8: memref<8x128xf32, #tpu.memory_space<vmem>>) attributes {dimension_semantics = [#tpu.dimension_semantics<parallel>], iteration_bounds = array<i64: 1>, scalar_prefetch = 0 : i64, scratch_operands = 0 : i64, tpu.core_type = #tpu.core_type<tc>, window_params = [{transform_indices = @transform_0, window_bounds = array<i64: 8, 32>}, {pipeline_mode = #tpu.pipeline_mode<synchronous>, transform_indices = @transform_1, window_bounds = array<i64: 32, 64>}, {pipeline_mode = #tpu.pipeline_mode<synchronous>, transform_indices = @transform_2, window_bounds = array<i64: 1, 64>}, {pipeline_mode = #tpu.pipeline_mode<synchronous>, transform_indices = @transform_3, window_bounds = array<i64: 64, 32>}, {pipeline_mode = #tpu.pipeline_mode<synchronous>, transform_indices = @transform_4, window_bounds = array<i64: 1, 32>}, {pipeline_mode = #tpu.pipeline_mode<synchronous>, transform_indices = @transform_5, window_bounds = array<i64: 32, 128>}, {pipeline_mode = #tpu.pipeline_mode<synchronous>, transform_indices = @transform_6, window_bounds = array<i64: 1, 128>}, {transform_indices = @transform_7, window_bounds = array<i64: 8, 128>}]} {
    %c0 = arith.constant 0 : index
    %c0_0 = arith.constant 0 : index
    %0 = vector.load %arg1[%c0, %c0_0] : memref<8x32xf32, #tpu.memory_space<vmem>>, vector<8x32xf32>
    %1 = arith.truncf %0 : vector<8x32xf32> to vector<8x32xbf16>
    %c0_1 = arith.constant 0 : index
    %c0_2 = arith.constant 0 : index
    %2 = vector.load %arg2[%c0_1, %c0_2] : memref<32x64xbf16, #tpu.memory_space<vmem>>, vector<32x64xbf16>
    %cst = arith.constant dense<0.000000e+00> : vector<8x64xf32>
    %3 = tpu.matmul %1, %2, %cst {dimension_numbers = #tpu.dot_dimension_numbers<[1], [0], [0], [1], [0, 0, 1, 1], [], []>} : vector<8x32xbf16>, vector<32x64xbf16>, vector<8x64xf32> -> vector<8x64xf32>
    %c0_3 = arith.constant 0 : index
    %c0_4 = arith.constant 0 : index
    %4 = vector.load %arg3[%c0_3, %c0_4] : memref<1x64xf32, #tpu.memory_space<vmem>>, vector<1x64xf32>
    %5 = vector.broadcast %4 : vector<1x64xf32> to vector<8x64xf32>
    %6 = arith.addf %3, %5 : vector<8x64xf32>
    %cst_5 = arith.constant 0.000000e+00 : f32
    %7 = vector.broadcast %cst_5 : f32 to vector<8x64xf32>
    %8 = arith.maximumf %6, %7 : vector<8x64xf32>
    %9 = arith.truncf %8 : vector<8x64xf32> to vector<8x64xbf16>
    %c0_6 = arith.constant 0 : index
    %c0_7 = arith.constant 0 : index
    %10 = vector.load %arg4[%c0_6, %c0_7] : memref<64x32xbf16, #tpu.memory_space<vmem>>, vector<64x32xbf16>
    %cst_8 = arith.constant dense<0.000000e+00> : vector<8x32xf32>
    %11 = tpu.matmul %9, %10, %cst_8 {dimension_numbers = #tpu.dot_dimension_numbers<[1], [0], [0], [1], [0, 0, 1, 1], [], []>} : vector<8x64xbf16>, vector<64x32xbf16>, vector<8x32xf32> -> vector<8x32xf32>
    %c0_9 = arith.constant 0 : index
    %c0_10 = arith.constant 0 : index
    %12 = vector.load %arg5[%c0_9, %c0_10] : memref<1x32xf32, #tpu.memory_space<vmem>>, vector<1x32xf32>
    %13 = vector.broadcast %12 : vector<1x32xf32> to vector<8x32xf32>
    %14 = arith.addf %11, %13 : vector<8x32xf32>
    %cst_11 = arith.constant 0.000000e+00 : f32
    %15 = vector.broadcast %cst_11 : f32 to vector<8x32xf32>
    %16 = arith.maximumf %14, %15 : vector<8x32xf32>
    %17 = arith.truncf %16 : vector<8x32xf32> to vector<8x32xbf16>
    %c0_12 = arith.constant 0 : index
    %c0_13 = arith.constant 0 : index
    %18 = vector.load %arg6[%c0_12, %c0_13] : memref<32x128xbf16, #tpu.memory_space<vmem>>, vector<32x128xbf16>
    %cst_14 = arith.constant dense<0.000000e+00> : vector<8x128xf32>
    %19 = tpu.matmul %17, %18, %cst_14 {dimension_numbers = #tpu.dot_dimension_numbers<[1], [0], [0], [1], [0, 0, 1, 1], [], []>} : vector<8x32xbf16>, vector<32x128xbf16>, vector<8x128xf32> -> vector<8x128xf32>
    %c0_15 = arith.constant 0 : index
    %c0_16 = arith.constant 0 : index
    %20 = vector.load %arg7[%c0_15, %c0_16] : memref<1x128xf32, #tpu.memory_space<vmem>>, vector<1x128xf32>
    %21 = vector.broadcast %20 : vector<1x128xf32> to vector<8x128xf32>
    %22 = arith.addf %19, %21 : vector<8x128xf32>
    %c0_17 = arith.constant 0 : index
    %c0_18 = arith.constant 0 : index
    %23 = vector.load %arg8[%c0_17, %c0_18] : memref<8x128xf32, #tpu.memory_space<vmem>>, vector<8x128xf32>
    tpu.vector_store %arg8[%c0_17, %c0_18], %22 {strides = array<i32>} : memref<8x128xf32, #tpu.memory_space<vmem>>, vector<8x128xf32>,
    return
  }
  func.func @transform_0(%arg0: i32) -> (i32, i32) {
    %c0_i32 = arith.constant 0 : i32
    %c0_i32_0 = arith.constant 0 : i32
    return %arg0, %c0_i32 : i32, i32
  }
  func.func @transform_1(%arg0: i32) -> (i32, i32) {
    %c0_i32 = arith.constant 0 : i32
    %c0_i32_0 = arith.constant 0 : i32
    %c0_i32_1 = arith.constant 0 : i32
    return %c0_i32, %c0_i32_0 : i32, i32
  }
  func.func @transform_2(%arg0: i32) -> (i32, i32) {
    %c0_i32 = arith.constant 0 : i32
    %c0_i32_0 = arith.constant 0 : i32
    %c0_i32_1 = arith.constant 0 : i32
    return %c0_i32, %c0_i32_0 : i32, i32
  }
  func.func @transform_3(%arg0: i32) -> (i32, i32) {
    %c0_i32 = arith.constant 0 : i32
    %c0_i32_0 = arith.constant 0 : i32
    %c0_i32_1 = arith.constant 0 : i32
    return %c0_i32, %c0_i32_0 : i32, i32
  }
  func.func @transform_4(%arg0: i32) -> (i32, i32) {
    %c0_i32 = arith.constant 0 : i32
    %c0_i32_0 = arith.constant 0 : i32
    %c0_i32_1 = arith.constant 0 : i32
    return %c0_i32, %c0_i32_0 : i32, i32
  }
  func.func @transform_5(%arg0: i32) -> (i32, i32) {
    %c0_i32 = arith.constant 0 : i32
    %c0_i32_0 = arith.constant 0 : i32
    %c0_i32_1 = arith.constant 0 : i32
    return %c0_i32, %c0_i32_0 : i32, i32
  }
  func.func @transform_6(%arg0: i32) -> (i32, i32) {
    %c0_i32 = arith.constant 0 : i32
    %c0_i32_0 = arith.constant 0 : i32
    %c0_i32_1 = arith.constant 0 : i32
    return %c0_i32, %c0_i32_0 : i32, i32
  }
  func.func @transform_7(%arg0: i32) -> (i32, i32) {
    %c0_i32 = arith.constant 0 : i32
    %c0_i32_0 = arith.constant 0 : i32
    return %arg0, %c0_i32 : i32, i32
  }
}

</mosaic_0001>

<bundles_post_ra>
// kernel: tpu_custom_call.1
= control target key start
LH: loop header
LB: loop body
LE: loop exit
PB: predicated region body
PF: predicated region fallthrough
CT: control target
= control target key end

     0   :  { %v351_v1 = vmov 0.0   ;;  %vm352_vm0 = vmmov 0   ;;  %vm53_vm1 = vcmask 261120   ;;  %s438_s0 = inlined_call_operand.vmem [shape: f32[8,32], index: 0, kind: input, shape index: {}]   ;;  %s439_s1 = inlined_call_operand.vmem [shape: bf16[32,64], index: 1, kind: input, shape index: {}]   ;;  %s440_s2 = inlined_call_operand.vmem [shape: f32[1,64], index: 2, kind: input, shape index: {}]   ;;  %s441_s3 = inlined_call_operand.vmem [shape: bf16[64,32], index: 3, kind: input, shape index: {}]   ;;  %s442_s4 = inlined_call_operand.vmem [shape: f32[1,32], index: 4, kind: input, shape index: {}]   ;;  %s443_s5 = inlined_call_operand.vmem [shape: bf16[32,128], index: 5, kind: input, shape index: {}]   ;;  %s444_s6 = inlined_call_operand.vmem [shape: f32[1,128], index: 6, kind: input, shape index: {}]   ;;  %s445_s7 = inlined_call_operand.hbm [shape: f32[8,128], index: 7, kind: output, shape index: {}]  }
   0x1   :  { %v321_v0 = vld [vmem:[%s439_s1 + $0x8] sm:$0xff]   ;;  %290 = vmatprep.subr.bf16.mxu0 %v351_v1  ;;  %v322_v2 = vld [vmem:[%s439_s1] sm:$0xff]   ;;  %298 = vmatprep.subr.bf16.mxu1 %v351_v1  ;;  %v323_v4 = vld [vmem:[%s441_s3 + $0x18] sm:$0xff]  }
   0x2   :  { %291 = vmatpush3.bf16.msra.mxu0 %v321_v0  ;;  %294 = vmatprep.mubr.msk.bf16.mxu0 %vm352_vm0, %v351_v1  ;;  %v28_v3 = vld [vmem:[%s438_s0] sm:$0xff]  ;;  %v324_v5 = vld [vmem:[%s441_s3 + $0x10] sm:$0xff]  }
   0x3   :  { %292 = vmatprep.subr.bf16.mxu0 %v351_v1  ;;  %306 = vmatprep.mubr.msk.bf16.mxu1 %vm352_vm0, %v351_v1  ;;  %v29_v6 = vpack.c.bf16 %v28_v3, %v28_v3 }
   0x4   :  { %299 = vmatpush3.bf16.msra.mxu1 %v323_v4 }
   0x5   :  { %300 = vmatprep.subr.bf16.mxu1 %v351_v1 }
   0x6   :  { %293 = vmatpush3.bf16.msra.mxu0 %v322_v2 }
   0x7   :  { %310 = vmatprep.subr.bf16.mxu0 %v351_v1 }
   0x8   :  { %12 = vsyncpa [#allocation3], 0  ;;  %301 = vmatpush3.bf16.msra.mxu1 %v324_v5  ;;  %v325_v7 = vld [vmem:[%s441_s3 + $0x8] sm:$0xff]   ;;  %v326_v8 = vld [vmem:[%s441_s3] sm:$0xff]   ;;  %vm138_vm2 = vcmask 523264   ;;  %s353_s21 = smov [#allocation2]  }
   0x9   :  { %295 = vmatmul.mubr.msk.bf16.vlgmr.msra.gmra.mxu0 %vm53_vm1, %v29_v6  ;;  %302 = vmatprep.subr.bf16.mxu1 %v351_v1  ;;  %v327_v9 = vld [vmem:[%s443_s5 + $0x8] sm:$0xff]   ;;  %v265_v10 = vld [vmem:[%s440_s2] ss:$0 sm:$0xff] }
   0xa   :  { %314 = vmatprep.mubr.msk.bf16.mxu0 %vm352_vm0, %v351_v1  ;;  %311 = vmatpush3.bf16.msra.mxu0 %v327_v9  ;;  %v328_v18 = vld [vmem:[%s443_s5] sm:$0xff]   ;;  %s257_s5 = sshll.u32 %s353_s21, 4  ;;  %s258_s5 = int_to_ptr.vmem [resolvable:$true] %s257_s5 }
   0xb   :  { %312 = vmatprep.subr.bf16.mxu0 %v351_v1  ;;  %v269_v19 = vld [vmem:[%s442_s4] ss:$0 sm:$0xff]  ;;  %s329_s4 = scalar_lea.vmem %s258_s5, 128  ;;  %p334_p1 = scmp.lt.s32.totalorder %s258_s5, %s258_s5 }
   0xc   :  { %303 = vmatpush3.bf16.msra.mxu1 %v325_v7  ;;  %v275_v27 = vld [vmem:[%s444_s6] ss:$0 sm:$0xff]  ;;  %p330_p0 = scmp.ne.s32.totalorder %s258_s5, %s329_s4  ;;  %p335_p2 = scmp.lt.s32.totalorder %s329_s4, %s329_s4 }
   0xd   :  { %304 = vmatprep.subr.bf16.mxu1 %v351_v1 }
   0xe   :  { %313 = vmatpush3.bf16.msra.mxu0 %v328_v18  ;;  %p336_p3 = por %p335_p2, %p334_p1 }
  0x10   :  { %305 = vmatpush3.bf16.msra.mxu1 %v326_v8  ;;  %p337_p4 = pnand %p336_p3, %p330_p0 }
  0xc9   :  { %v91_v11 = vpop.f32.mrf.mxu0 }
  0xca   :  { %v92_v12 = vadd.f32 %v265_v10, %v91_v11 }
  0xcb   :  { %v296_v13 = vpop.f32.mrf.mxu0 }
  0xcc   :  { %v97_v14 = vmax.f32 %v92_v12, 0.0 }
  0xcd   :  { %v94_v15 = vpop.f32.mrf.mxu0 }
  0xce   :  { %v98_v16 = vpack.c.bf16 %v97_v14, %v97_v14 }
  0xcf   :  { %v297_v17 = vpop.f32.mrf.mxu0 }
  0xd0   :  { %307 = vmatmul.mubr.msk.bf16.vlgmr.msra.gmra.mxu1 %vm138_vm2, %v98_v16 }
 0x190   :  { %v176_v20 = vpop.f32.mrf.mxu1 }
 0x191   :  { %v177_v21 = vadd.f32 %v269_v19, %v176_v20 }
 0x192   :  { %v308_v22 = vpop.f32.mrf.mxu1 }
 0x193   :  { %v182_v23 = vmax.f32 %v177_v21, 0.0 }
 0x194   :  { %v179_v24 = vpop.f32.mrf.mxu1 }
 0x195   :  { %v183_v25 = vpack.c.bf16 %v182_v23, %v182_v23 }
 0x196   :  { %v309_v26 = vpop.f32.mrf.mxu1 }
 0x197   :  { %315 = vmatmul.mubr.msk.bf16.vlgmr.msra.gmra.mxu0 %vm53_vm1, %v183_v25 }
 0x257   :  { %v244_v28 = vpop.f32.mrf.mxu0 }
 0x258   :  { %v245_v29 = vadd.f32 %v275_v27, %v244_v28 }
 0x259   :  { %v316_v30 = vpop.f32.mrf.mxu0 }
 0x25a   :  { %250 = vst [vmem:[#allocation2] sm:$0xff] %v245_v29 }
 0x25b   :  { %v247_v31 = vpop.f32.mrf.mxu0 }
 0x25c   :  { %340 = shalt.err (!%p337_p4)
}
 0x25d   :  { %260 = dma.vmem_to_hbm [thread:$0]  %s258_s5, 128, %s445_s7, [#allocation3]   ;;  %v317_v32 = vpop.f32.mrf.mxu0 }
 0x25e   :  { %349 = dma.done.wait [#allocation3], 128  }
 0x25f   :  { %350 = vsyncadd [#allocation3], 4294967168 }
 0x260   :  { %264 = vsyncpa [#allocation3], 1 }

// kernel: tpu_custom_call.1
= control target key start
LH: loop header
LB: loop body
LE: loop exit
PB: predicated region body
PF: predicated region fallthrough
CT: control target
= control target key end

     0   :  { %v351_v1 = vmov 0.0   ;;  %vm352_vm0 = vmmov 0   ;;  %vm53_vm1 = vcmask 261120   ;;  %s438_s0 = inlined_call_operand.vmem [shape: f32[8,32], index: 0, kind: input, shape index: {}]   ;;  %s439_s1 = inlined_call_operand.vmem [shape: bf16[32,64], index: 1, kind: input, shape index: {}]   ;;  %s440_s2 = inlined_call_operand.vmem [shape: f32[1,64], index: 2, kind: input, shape index: {}]   ;;  %s441_s3 = inlined_call_operand.vmem [shape: bf16[64,32], index: 3, kind: input, shape index: {}]   ;;  %s442_s4 = inlined_call_operand.vmem [shape: f32[1,32], index: 4, kind: input, shape index: {}]   ;;  %s443_s5 = inlined_call_operand.vmem [shape: bf16[32,128], index: 5, kind: input, shape index: {}]   ;;  %s444_s6 = inlined_call_operand.vmem [shape: f32[1,128], index: 6, kind: input, shape index: {}]   ;;  %s445_s7 = inlined_call_operand.hbm [shape: f32[8,128], index: 7, kind: output, shape index: {}]  }
   0x1   :  { %v321_v0 = vld [vmem:[%s439_s1 + $0x8] sm:$0xff]   ;;  %290 = vmatprep.subr.bf16.mxu0 %v351_v1  ;;  %v322_v2 = vld [vmem:[%s439_s1] sm:$0xff]   ;;  %298 = vmatprep.subr.bf16.mxu1 %v351_v1  ;;  %v323_v4 = vld [vmem:[%s441_s3 + $0x18] sm:$0xff]  }
   0x2   :  { %291 = vmatpush3.bf16.msra.mxu0 %v321_v0  ;;  %294 = vmatprep.mubr.msk.bf16.mxu0 %vm352_vm0, %v351_v1  ;;  %v28_v3 = vld [vmem:[%s438_s0] sm:$0xff]  ;;  %v324_v5 = vld [vmem:[%s441_s3 + $0x10] sm:$0xff]  }
   0x3   :  { %292 = vmatprep.subr.bf16.mxu0 %v351_v1  ;;  %306 = vmatprep.mubr.msk.bf16.mxu1 %vm352_vm0, %v351_v1  ;;  %v29_v6 = vpack.c.bf16 %v28_v3, %v28_v3 }
   0x4   :  { %299 = vmatpush3.bf16.msra.mxu1 %v323_v4 }
   0x5   :  { %300 = vmatprep.subr.bf16.mxu1 %v351_v1 }
   0x6   :  { %293 = vmatpush3.bf16.msra.mxu0 %v322_v2 }
   0x7   :  { %310 = vmatprep.subr.bf16.mxu0 %v351_v1 }
   0x8   :  { %12 = vsyncpa [#allocation3], 0  ;;  %301 = vmatpush3.bf16.msra.mxu1 %v324_v5  ;;  %v325_v7 = vld [vmem:[%s441_s3 + $0x8] sm:$0xff]   ;;  %v326_v8 = vld [vmem:[%s441_s3] sm:$0xff]   ;;  %vm138_vm2 = vcmask 523264   ;;  %s353_s21 = smov [#allocation2]  }
   0x9   :  { %295 = vmatmul.mubr.msk.bf16.vlgmr.msra.gmra.mxu0 %vm53_vm1, %v29_v6  ;;  %302 = vmatprep.subr.bf16.mxu1 %v351_v1  ;;  %v327_v9 = vld [vmem:[%s443_s5 + $0x8] sm:$0xff]   ;;  %v265_v10 = vld [vmem:[%s440_s2] ss:$0 sm:$0xff] }
   0xa   :  { %314 = vmatprep.mubr.msk.bf16.mxu0 %vm352_vm0, %v351_v1  ;;  %311 = vmatpush3.bf16.msra.mxu0 %v327_v9  ;;  %v328_v18 = vld [vmem:[%s443_s5] sm:$0xff]   ;;  %s257_s5 = sshll.u32 %s353_s21, 4  ;;  %s258_s5 = int_to_ptr.vmem [resolvable:$true] %s257_s5 }
   0xb   :  { %312 = vmatprep.subr.bf16.mxu0 %v351_v1  ;;  %v269_v19 = vld [vmem:[%s442_s4] ss:$0 sm:$0xff]  ;;  %s329_s4 = scalar_lea.vmem %s258_s5, 128  ;;  %p334_p1 = scmp.lt.s32.totalorder %s258_s5, %s258_s5 }
   0xc   :  { %303 = vmatpush3.bf16.msra.mxu1 %v325_v7  ;;  %v275_v27 = vld [vmem:[%s444_s6] ss:$0 sm:$0xff]  ;;  %p330_p0 = scmp.ne.s32.totalorder %s258_s5, %s329_s4  ;;  %p335_p2 = scmp.lt.s32.totalorder %s329_s4, %s329_s4 }
   0xd   :  { %304 = vmatprep.subr.bf16.mxu1 %v351_v1 }
   0xe   :  { %313 = vmatpush3.bf16.msra.mxu0 %v328_v18  ;;  %p336_p3 = por %p335_p2, %p334_p1 }
  0x10   :  { %305 = vmatpush3.bf16.msra.mxu1 %v326_v8  ;;  %p337_p4 = pnand %p336_p3, %p330_p0 }
  0xc9   :  { %v91_v11 = vpop.f32.mrf.mxu0 }
  0xca   :  { %v92_v12 = vadd.f32 %v265_v10, %v91_v11 }
  0xcb   :  { %v296_v13 = vpop.f32.mrf.mxu0 }
  0xcc   :  { %v97_v14 = vmax.f32 %v92_v12, 0.0 }
  0xcd   :  { %v94_v15 = vpop.f32.mrf.mxu0 }
  0xce   :  { %v98_v16 = vpack.c.bf16 %v97_v14, %v97_v14 }
  0xcf   :  { %v297_v17 = vpop.f32.mrf.mxu0 }
  0xd0   :  { %307 = vmatmul.mubr.msk.bf16.vlgmr.msra.gmra.mxu1 %vm138_vm2, %v98_v16 }
 0x190   :  { %v176_v20 = vpop.f32.mrf.mxu1 }
 0x191   :  { %v177_v21 = vadd.f32 %v269_v19, %v176_v20 }
 0x192   :  { %v308_v22 = vpop.f32.mrf.mxu1 }
 0x193   :  { %v182_v23 = vmax.f32 %v177_v21, 0.0 }
 0x194   :  { %v179_v24 = vpop.f32.mrf.mxu1 }
 0x195   :  { %v183_v25 = vpack.c.bf16 %v182_v23, %v182_v23 }
 0x196   :  { %v309_v26 = vpop.f32.mrf.mxu1 }
 0x197   :  { %315 = vmatmul.mubr.msk.bf16.vlgmr.msra.gmra.mxu0 %vm53_vm1, %v183_v25 }
 0x257   :  { %v244_v28 = vpop.f32.mrf.mxu0 }
 0x258   :  { %v245_v29 = vadd.f32 %v275_v27, %v244_v28 }
 0x259   :  { %v316_v30 = vpop.f32.mrf.mxu0 }
 0x25a   :  { %250 = vst [vmem:[#allocation2] sm:$0xff] %v245_v29 }
 0x25b   :  { %v247_v31 = vpop.f32.mrf.mxu0 }
 0x25c   :  { %340 = shalt.err (!%p337_p4)
}
 0x25d   :  { %260 = dma.vmem_to_hbm [thread:$0]  %s258_s5, 128, %s445_s7, [#allocation3]   ;;  %v317_v32 = vpop.f32.mrf.mxu0 }
 0x25e   :  { %349 = dma.done.wait [#allocation3], 128  }
 0x25f   :  { %350 = vsyncadd [#allocation3], 4294967168 }
 0x260   :  { %264 = vsyncpa [#allocation3], 1 }

</bundles_post_ra>
